<compile_context>
chip_gen: v7x
topology: tpu7x:2x2x1
jax: 0.10.0
libtpu: 0.0.40
codegen_flags: <defaults>
</compile_context>

<pallas_src>
import functools
import math

import jax
import jax.numpy as jnp
from jax import lax
from jax.experimental import pallas as pl
from jax.experimental.pallas import tpu as pltpu

_NSEM = 8  # round-robin DMA semaphores for the per-row gather copies


def build_pe_matrix(max_seq_len: int, embed_dim: int) -> jnp.ndarray:
    """Matches the PyTorch double loop exactly."""
    pos = jnp.arange(max_seq_len, dtype=jnp.float32)[:, None]           # (L, 1)
    i_even = jnp.arange(0, embed_dim, 2, dtype=jnp.float32)[None, :]    # (1, E/2)
    div = jnp.power(10000.0, i_even / embed_dim)                        # 10000 ** (i/E)
    angles = pos / div                                                  # (L, E/2)
    pe = jnp.zeros((max_seq_len, embed_dim), dtype=jnp.float32)
    pe = pe.at[:, 0::2].set(jnp.sin(angles))
    pe = pe.at[:, 1::2].set(jnp.cos(angles))
    return pe


def _round_up(x: int, m: int) -> int:
    return ((x + m - 1) // m) * m


def _pos_embed_kernel(ids_ref, emb_hbm, pe_ref, out_ref, gbuf, sems,
                      *, seq_pad: int, tile_s: int):
    # ids_ref : (B * seq_pad,) int32 token ids in SMEM (scalar prefetch)
    # emb_hbm : (V, E) embedding table left in HBM (sqrt(E) already folded in)
    # pe_ref  : (tile_s, E) positional-encoding tile for this sequence tile
    # out_ref : (1, tile_s, E) output slab
    # gbuf    : (tile_s, E) VMEM scratch for the gathered embedding rows
    # sems    : (_NSEM,) DMA semaphores, round-robin over the row copies
    j = pl.program_id(0)            # sequence-tile index (outermost)
    b = pl.program_id(1)            # batch index (innermost)
    base = b * seq_pad + j * tile_s

    # Issue all per-row gather DMAs first (many copies in flight) ...
    def _issue(r, carry):
        tok = ids_ref[base + r]
        pltpu.make_async_copy(emb_hbm.at[tok], gbuf.at[r], sems.at[r % _NSEM]).start()
        return carry
    lax.fori_loop(0, tile_s, _issue, 0)

    # ... then wait for all of them.
    def _wait(r, carry):
        pltpu.make_async_copy(emb_hbm.at[0], gbuf.at[r], sems.at[r % _NSEM]).wait()
        return carry
    lax.fori_loop(0, tile_s, _wait, 0)

    # Table already carries the sqrt(E) scale -> pure add with the PE tile.
    out_ref[...] = (gbuf[...] + pe_ref[...])[None]


def positional_embedding(src, emb_table_scaled, pe_full, *, tile_s=256):
    """src: (B, S) int token ids.
    emb_table_scaled: (V, E) f32 embedding table with sqrt(E) already folded in.
    pe_full: (max_seq_len, E) f32 sinusoidal table.
    Returns (B, S, E) f32 = embedding[src] * sqrt(E) + pe[:S]."""
    B, S = src.shape
    V, E = emb_table_scaled.shape

    Ts = _round_up(min(tile_s, _round_up(S, 8)), 8)   # rows per grid step (mult of 8)
    S_pad = _round_up(S, Ts)
    n_seq_tiles = S_pad // Ts

    # Flat 1-D ids in SMEM (avoids 2-D SMEM padding); clamp guards OOB gather DMAs.
    ids = jnp.clip(src.astype(jnp.int32), 0, V - 1)
    ids = jnp.pad(ids, ((0, 0), (0, S_pad - S)))
    ids_flat = ids.reshape(B * S_pad)

    pe = pe_full[:S, :]
    if S_pad != S:
        pe = jnp.pad(pe, ((0, S_pad - S), (0, 0)))

    kernel = functools.partial(_pos_embed_kernel, seq_pad=S_pad, tile_s=Ts)

    grid_spec = pltpu.PrefetchScalarGridSpec(
        num_scalar_prefetch=1,
        grid=(n_seq_tiles, B),          # seq-tile outermost -> PE block reused across B
        in_specs=[
            pl.BlockSpec(memory_space=pl.ANY),                 # emb table stays in HBM
            pl.BlockSpec((Ts, E), lambda j, b, ids: (j, 0)),   # PE tile, batch-invariant
        ],
        out_specs=pl.BlockSpec((1, Ts, E), lambda j, b, ids: (b, j, 0)),
        scratch_shapes=[
            pltpu.VMEM((Ts, E), jnp.float32),     # gathered embedding rows
            pltpu.SemaphoreType.DMA((_NSEM,)),    # round-robin gather semaphores
        ],
    )

    out = pl.pallas_call(
        kernel,
        out_shape=jax.ShapeDtypeStruct((B, S_pad, E), jnp.float32),
        grid_spec=grid_spec,
        compiler_params=pltpu.CompilerParams(
            dimension_semantics=("parallel", "parallel"),
        ),
    )(ids_flat, emb_table_scaled, pe)

    return out[:, :S, :]


if __name__ == "__main__":
    # Small, deterministic configuration consistent with the module.
    embed_dim = 32
    vocab_size = 64
    max_seq_len = 16
    batch = 2
    seq_len = 8  # seq_len <= max_seq_len

    key = jax.random.PRNGKey(0)
    k_emb, k_src = jax.random.split(key)

    # nn.Embedding default init: N(0, 1)
    emb_table = jax.random.normal(k_emb, (vocab_size, embed_dim), dtype=jnp.float32)
    scale = math.sqrt(embed_dim)
    # Fold sqrt(E) into the table once at parameter-load time (not per call).
    emb_table_scaled = emb_table * scale

    pe_full = build_pe_matrix(max_seq_len, embed_dim)
    src = jax.random.randint(k_src, (batch, seq_len), 0, vocab_size, dtype=jnp.int32)

    out = positional_embedding(src, emb_table_scaled, pe_full)
    out = jax.block_until_ready(out)

    # Pure-JAX reference for correctness.
    ref = jnp.take(emb_table, src, axis=0) * scale + pe_full[:seq_len][None, :, :]
    assert out.shape == (batch, seq_len, embed_dim)
    assert jnp.allclose(out, ref, atol=1e-5, rtol=1e-5)

    print("KERNEL_OK")
</pallas_src>

<mosaic_0001>
module attributes {stable_mosaic.version = 11 : i64} {
  func.func @_pos_embed_kernel(%arg0: i32, %arg1: i32, %arg2: memref<16xi32, #tpu.memory_space<smem>>, %arg3: memref<64x32xf32, #tpu.memory_space<any>>, %arg4: memref<8x32xf32, #tpu.memory_space<vmem>>, %arg5: memref<1x8x32xf32, #tpu.memory_space<vmem>>, %arg6: memref<8x32xf32, #tpu.memory_space<vmem>>, %arg7: memref<8x!tpu.dma_semaphore, #tpu.memory_space<semaphore_mem>>) attributes {dimension_semantics = [#tpu.dimension_semantics<parallel>, #tpu.dimension_semantics<parallel>], iteration_bounds = array<i64: 1, 2>, scalar_prefetch = 1 : i64, scratch_operands = 2 : i64, tpu.core_type = #tpu.core_type<tc>, window_params = [{}, {transform_indices = @transform_1, window_bounds = array<i64: 8, 32>}, {transform_indices = @transform_2, window_bounds = array<i64: 1, 8, 32>}]} {
    %c8_i32 = arith.constant 8 : i32
    %0 = arith.muli %arg1, %c8_i32 : i32
    %c8_i32_0 = arith.constant 8 : i32
    %1 = arith.muli %arg0, %c8_i32_0 : i32
    %2 = arith.addi %0, %1 : i32
    %c0_i32 = arith.constant 0 : i32
    %c8_i32_1 = arith.constant 8 : i32
    %3 = arith.addi %c0_i32, %c8_i32_1 : i32
    %c1_i32 = arith.constant 1 : i32
    scf.for %arg8 = %c0_i32 to %3 step %c1_i32  : i32 {
      %10 = arith.addi %2, %arg8 : i32
      %11 = arith.index_cast %10 : i32 to index
      %12 = memref.load %arg2[%11] : memref<16xi32, #tpu.memory_space<smem>>
      %c8_i32_13 = arith.constant 8 : i32
      %c0_i32_14 = arith.constant 0 : i32
      %13 = arith.cmpi eq, %c8_i32_13, %c0_i32_14 : i32
      %c1_i32_15 = arith.constant 1 : i32
      %14 = arith.select %13, %c1_i32_15, %c8_i32_13 : i32
      %15 = arith.remsi %arg8, %14 : i32
      %c0_i32_16 = arith.constant 0 : i32
      %16 = arith.cmpi ne, %15, %c0_i32_16 : i32
      %c0_i32_17 = arith.constant 0 : i32
      %17 = arith.cmpi slt, %15, %c0_i32_17 : i32
      %c0_i32_18 = arith.constant 0 : i32
      %18 = arith.cmpi slt, %14, %c0_i32_18 : i32
      %19 = arith.xori %17, %18 : i1
      %20 = arith.andi %19, %16 : i1
      %21 = arith.addi %15, %14 : i32
      %22 = arith.select %20, %21, %15 : i32
      %c0_i32_19 = arith.constant 0 : i32
      %23 = tpu.memref_slice %arg3[%12, %c0_i32_19] : memref<64x32xf32, #tpu.memory_space<any>> -> memref<1x32xf32, #tpu.memory_space<any>>
      %24 = tpu.memref_squeeze %23 : memref<1x32xf32, #tpu.memory_space<any>> -> memref<32xf32, #tpu.memory_space<any>>
      %c0_i32_20 = arith.constant 0 : i32
      %25 = tpu.memref_slice %arg6[%arg8, %c0_i32_20] : memref<8x32xf32, #tpu.memory_space<vmem>> -> memref<1x32xf32, #tpu.memory_space<vmem>>
      %26 = tpu.memref_squeeze %25 : memref<1x32xf32, #tpu.memory_space<vmem>> -> memref<32xf32, #tpu.memory_space<vmem>>
      %27 = tpu.memref_slice %arg7[%22] : memref<8x!tpu.dma_semaphore, #tpu.memory_space<semaphore_mem>> -> memref<1x!tpu.dma_semaphore, #tpu.memory_space<semaphore_mem>>
      %28 = tpu.memref_squeeze %27 : memref<1x!tpu.dma_semaphore, #tpu.memory_space<semaphore_mem>> -> memref<!tpu.dma_semaphore, #tpu.memory_space<semaphore_mem>>
      tpu.enqueue_dma source(%24 : memref<32xf32, #tpu.memory_space<any>>) target(%26 : memref<32xf32, #tpu.memory_space<vmem>>) target_semaphore(%28 : memref<!tpu.dma_semaphore, #tpu.memory_space<semaphore_mem>>)
    }
    %c8_i32_2 = arith.constant 8 : i32
    %c0_i32_3 = arith.constant 0 : i32
    %c8_i32_4 = arith.constant 8 : i32
    %4 = arith.addi %c0_i32_3, %c8_i32_4 : i32
    %c1_i32_5 = arith.constant 1 : i32
    scf.for %arg8 = %c0_i32_3 to %4 step %c1_i32_5  : i32 {
      %c8_i32_13 = arith.constant 8 : i32
      %c0_i32_14 = arith.constant 0 : i32
      %10 = arith.cmpi eq, %c8_i32_13, %c0_i32_14 : i32
      %c1_i32_15 = arith.constant 1 : i32
      %11 = arith.select %10, %c1_i32_15, %c8_i32_13 : i32
      %12 = arith.remsi %arg8, %11 : i32
      %c0_i32_16 = arith.constant 0 : i32
      %13 = arith.cmpi ne, %12, %c0_i32_16 : i32
      %c0_i32_17 = arith.constant 0 : i32
      %14 = arith.cmpi slt, %12, %c0_i32_17 : i32
      %c0_i32_18 = arith.constant 0 : i32
      %15 = arith.cmpi slt, %11, %c0_i32_18 : i32
      %16 = arith.xori %14, %15 : i1
      %17 = arith.andi %16, %13 : i1
      %18 = arith.addi %12, %11 : i32
      %19 = arith.select %17, %18, %12 : i32
      %c0_i32_19 = arith.constant 0 : i32
      %c0_i32_20 = arith.constant 0 : i32
      %20 = tpu.memref_slice %arg3[%c0_i32_19, %c0_i32_20] : memref<64x32xf32, #tpu.memory_space<any>> -> memref<1x32xf32, #tpu.memory_space<any>>
      %21 = tpu.memref_squeeze %20 : memref<1x32xf32, #tpu.memory_space<any>> -> memref<32xf32, #tpu.memory_space<any>>
      %c0_i32_21 = arith.constant 0 : i32
      %22 = tpu.memref_slice %arg6[%arg8, %c0_i32_21] : memref<8x32xf32, #tpu.memory_space<vmem>> -> memref<1x32xf32, #tpu.memory_space<vmem>>
      %23 = tpu.memref_squeeze %22 : memref<1x32xf32, #tpu.memory_space<vmem>> -> memref<32xf32, #tpu.memory_space<vmem>>
      %24 = tpu.memref_slice %arg7[%19] : memref<8x!tpu.dma_semaphore, #tpu.memory_space<semaphore_mem>> -> memref<1x!tpu.dma_semaphore, #tpu.memory_space<semaphore_mem>>
      %25 = tpu.memref_squeeze %24 : memref<1x!tpu.dma_semaphore, #tpu.memory_space<semaphore_mem>> -> memref<!tpu.dma_semaphore, #tpu.memory_space<semaphore_mem>>
      tpu.wait_dma2 semaphore(%25 : memref<!tpu.dma_semaphore, #tpu.memory_space<semaphore_mem>>) src(%21 : memref<32xf32, #tpu.memory_space<any>>) dst(%23 : memref<32xf32, #tpu.memory_space<vmem>>)
    }
    %c8_i32_6 = arith.constant 8 : i32
    %c0 = arith.constant 0 : index
    %c0_7 = arith.constant 0 : index
    %5 = vector.load %arg6[%c0, %c0_7] : memref<8x32xf32, #tpu.memory_space<vmem>>, vector<8x32xf32>
    %c0_8 = arith.constant 0 : index
    %c0_9 = arith.constant 0 : index
    %6 = vector.load %arg4[%c0_8, %c0_9] : memref<8x32xf32, #tpu.memory_space<vmem>>, vector<8x32xf32>
    %7 = arith.addf %5, %6 : vector<8x32xf32>
    %8 = vector.shape_cast %7 : vector<8x32xf32> to vector<1x8x32xf32>
    %c0_10 = arith.constant 0 : index
    %c0_11 = arith.constant 0 : index
    %c0_12 = arith.constant 0 : index
    %9 = vector.load %arg5[%c0_10, %c0_11, %c0_12] : memref<1x8x32xf32, #tpu.memory_space<vmem>>, vector<1x8x32xf32>
    tpu.vector_store %arg5[%c0_10, %c0_11, %c0_12], %8 {strides = array<i32>} : memref<1x8x32xf32, #tpu.memory_space<vmem>>, vector<1x8x32xf32>,
    return
  }
  func.func @transform_1(%arg0: i32, %arg1: i32, %arg2: memref<16xi32, #tpu.memory_space<smem>>) -> (i32, i32) {
    %c0_i32 = arith.constant 0 : i32
    %c0_i32_0 = arith.constant 0 : i32
    return %arg0, %c0_i32 : i32, i32
  }
  func.func @transform_2(%arg0: i32, %arg1: i32, %arg2: memref<16xi32, #tpu.memory_space<smem>>) -> (i32, i32, i32) {
    %c0_i32 = arith.constant 0 : i32
    %c0_i32_0 = arith.constant 0 : i32
    return %arg1, %arg0, %c0_i32 : i32, i32, i32
  }
}

</mosaic_0001>

<bundles_post_ra>
// kernel: tpu_custom_call.1
= control target key start
LH: loop header
LB: loop body
LE: loop exit
PB: predicated region body
PF: predicated region fallthrough
CT: control target
= control target key end

     0   :  { %s754_s0 = inlined_call_operand.vmem [shape: s32[16], index: 0, kind: input, shape index: {}]   ;;  %s755_s1 = inlined_call_operand.vmem [shape: f32[64,32], index: 1, kind: input, shape index: {}]   ;;  %s756_s2 = inlined_call_operand.vmem [shape: f32[8,32], index: 2, kind: input, shape index: {}]   ;;  %s757_s3 = inlined_call_operand.hbm [shape: f32[2,8,32], index: 3, kind: output, shape index: {}]  }
   0x1   :  { %s8_s14 = sshll.u32 %s754_s0, 4  ;;  %s9_s14 = int_to_ptr.vmem [resolvable:$true] %s8_s14 }
   0x2   :  { %s492_s15 = scalar_lea.vmem %s9_s14, 16  ;;  %p497_p1 = scmp.lt.s32.totalorder %s9_s14, %s9_s14 }
   0x3   :  { %p493_p0 = scmp.ne.s32.totalorder %s9_s14, %s492_s15  ;;  %p498_p2 = scmp.lt.s32.totalorder %s492_s15, %s492_s15 }
   0x5   :  { %p499_p3 = por %p498_p2, %p497_p1 }
   0x7   :  { %p500_p4 = pnand %p499_p3, %p493_p0 }
   0x9   :  { %503 = shalt.err (!%p500_p4)  }
   0xa   :  { %s604_s16 = smov [#allocation5]  }
   0xb   :  { %11 = dma.vmem_to_smem %s9_s14, 16, %s604_s16, [#allocation4] }
   0xc   :  { %564 = dma.done.wait [#allocation4], 16 }
   0xd   :  { %565 = vsyncadd [#allocation4], 4294967280 }
   0xe   :  { %13 = sfence }
   0xf   :  { %14 = vsyncpa [#allocation7], 0 }
  0x10   :  { %16 = vsyncpa [#allocation7 + $0x1], 0  ;;  %s629_s17 = smov 0   ;;  %s631_s18 = smov 0  }
  0x11   :  { %s633_s0 = smov 0   ;;  %s635_s19 = smov 0  }
  0x12   :  { %s637_s20 = smov 0   ;;  %s639_s21 = smov 0  }
  0x13 LB: > { %s395_s22 = sadd.s32 4294967295, %s594_s21   ;;  %s396_s23 = sadd.s32 4294967294, %s594_s21   ;;  %s594_s21 = sphi %s639_s21, %s22_s21   ;;  %s590_s20 = sphi %s637_s20, %s764_s20   ;;  %s586_s19 = sphi %s635_s19, %s763_s19   ;;  %s582_s0 = sphi %s633_s0, %s762_s0   ;;  %s578_s18 = sphi %s631_s18, %s761_s18   ;;  %s574_s17 = sphi %s629_s17, %s760_s17  }
  0x14   : > { %s31_s24 = sadd.s32 1, %s590_s20  ;;  %s69_s25 = sadd.s32 1, %s582_s0 }
  0x15   : > { %p32_p5 = scmp.ge.s32.totalorder %s31_s24, 2  ;;  %p79_p6 = scmp.ne.s32.totalorder %s582_s0, %s578_s18 }
  0x16   : > { %p80_p7 = scmp.eq.s32.totalorder %s395_s22, 1  ;;  %p85_p8 = scmp.ne.s32.totalorder %s578_s18, %s574_s17 }
  0x17   : > { %s766_s24 = smov (%p32_p5, %s31_s24), 0  ;;  %p86_p10 = scmp.eq.s32.totalorder %s396_s23, 1 }
  0x18   : > { %p669_p9 = por %p80_p7, %p79_p6  ;;  %s64_s27 = ssub.s32 %s590_s20, %s766_s24 }
  0x19   : > { %p399_p11 = scmp.ge.s32.totalorder %s594_s21, 1  ;;  %p67_p12 = scmp.eq.s32.totalorder %s64_s27, 0 }
  0x1a   : > { %p676_p13 = por %p86_p10, %p85_p8  ;;  %p111_p0 = scmp.lt.s32.totalorder %s594_s21, 3 }
  0x1b   : > { %s682_s29 = scalar_select %p67_p12, %s582_s0, %s69_s25  }
  0x1c   : > { %p112_p1 = pnand %p399_p11, %p111_p0 }
  0x1d   : > { %s127_s30 = sand.u32 (!%p112_p1), 1, %s578_s18   ;;  %s401_s4 = sshll.u32 (!%p112_p1), %s586_s19, 3 }
  0x1e   : > { %115 = sbr.rel (%p112_p1) target bundleno = 94 (0x5e), region = 24  ;;  %s688_s5 = sshll.u32 (!%p112_p1), %s127_s30, 3 }
  0x1f   : > { %s129_s6 = scalar_lea.vmem (!%p112_p1), [#allocation6], %s688_s5  ;;  %s596_s7 = smov (!%p112_p1), 0  }
  0x25 LB: >> { %s143_s8 = sadd.s32 %s598_s7, %s401_s4  ;;  %p145_p2 = scmp.lt.s32.totalorder %s598_s7, 0  ;;  %s598_s7 = sphi %s596_s7, %s142_s7  }
  0x26   : >> { %s144_s9 = sld [smem:[#allocation5 + %s143_s8]]  ;;  %s146_s10 = ssub.s32 0, %s598_s7 }
  0x27   : >> { %s402_s11 = smin.u32 %s598_s7, %s146_s10  ;;  %s158_s23 = scalar_lea.vmem [#allocation2], %s598_s7 }
  0x28   : >> { %s148_s12 = sand.u32 7, %s402_s11  }
  0x29   : >> { %s149_s13 = ssub.s32 0, %s148_s12 }
  0x2a   : >> { %s768_s13 = smov (!%p145_p2, %s149_s13), %s148_s12 }
  0x2b   : >> { %p404_p3 = scmp.lt.s32.totalorder %s768_s13, 0  ;;  %s155_s14 = sadd.s32 8, %s768_s13 }
  0x2c   : >> { %s157_s22 = scalar_lea.vmem %s755_s1, %s144_s9 }
  0x2d   : >> { %s770_s14 = smov (!%p404_p3, %s155_s14), %s768_s13  ;;  %v177_v0 = vld [vmem:[%s157_s22] sm:$0x1] }
  0x2e   : >> { %178 = vst [vmem:[%s158_s23] sm:$0x1] %v177_v0  ;;  %s159_s25 = scalar_lea.sflag [#allocation3], %s770_s14 }
  0x2f   : >> { %203 = vsyncadd %s159_s25, 16  ;;  %s142_s7 = sadd.s32 1, %s598_s7  }
  0x30   : >> { %p139_p4 = scmp.ge.s32.totalorder %s142_s7, 8  }
  0x31   : > { %s600_s27 = smov (%p139_p4), 0  }
  0x32   : > { %141 = sbr.rel (!%p139_p4) target bundleno = 37 (0x25), region = 124 }
  0x39 LB: >> { %p210_p5 = scmp.lt.s32.totalorder %s602_s27, 0  ;;  %s211_s8 = ssub.s32 0, %s602_s27  ;;  %s602_s27 = sphi %s600_s27, %s209_s27  }
  0x3a   : >> { %s405_s10 = smin.u32 %s602_s27, %s211_s8 }
  0x3b   : >> { %s213_s11 = sand.u32 7, %s405_s10  }
  0x3c   : >> { %s214_s12 = ssub.s32 0, %s213_s11 }
  0x3d   : >> { %s772_s12 = smov (!%p210_p5, %s214_s12), %s213_s11 }
  0x3e   : >> { %p407_p6 = scmp.lt.s32.totalorder %s772_s12, 0  ;;  %s220_s9 = sadd.s32 8, %s772_s12 }
  0x40   : >> { %s774_s9 = smov (!%p407_p6, %s220_s9), %s772_s12 }
  0x41   : >> { %s222_s13 = scalar_lea.sflag [#allocation3], %s774_s9 }
  0x42   : >> { %566 = dma.done.wait %s222_s13, 16 }
  0x43   : >> { %567 = vsyncadd %s222_s13, 4294967280  ;;  %s209_s27 = sadd.s32 1, %s602_s27  }
  0x44   : >> { %p206_p7 = scmp.ge.s32.totalorder %s209_s27, 8  }
  0x45   : > { %v225_v1 = vld [vmem:[#allocation2] sm:$0xff] (%p206_p7)  ;;  %vm228_vm0 = vcmask (%p206_p7), 261120   ;;  %s409_s14 = sshll.u32 (%p206_p7), %s586_s19, 7  ;;  %s245_s23 = sshll.u32 (%p206_p7), %s129_s6, 4  ;;  %s705_s23 = int_to_ptr.vmem [resolvable:$true] %s245_s23 }
  0x46   : > { %208 = sbr.rel (!%p206_p7) target bundleno = 57 (0x39), region = 135  ;;  %v226_v2 = vld [vmem:[%s756_s2] sm:$0xff] (%p206_p7)  ;;  %s701_s22 = scalar_lea.hbm (%p206_p7), %s757_s3, %s409_s14 }
  0x47   : > { %v227_v3 = vadd.f32 (%p206_p7), %v226_v2, %v225_v1  ;;  %s231_s25 = scalar_lea.sflag (%p206_p7), [#allocation7], %s127_s30  ;;  %s504_s27 = scalar_lea.vmem (%p206_p7), %s705_s23, 128 }
  0x48   : > { %p505_p8 = scmp.ne.s32.totalorder (%p206_p7), %s705_s23, %s504_s27  ;;  %s605_s19 = smov (%p206_p7), [#allocation6]  }
  0x49   : > { %229 = vst.msk [vmem:[%s129_s6] sm:$0xff] (%p206_p7), %vm228_vm0, %v227_v3  ;;  %s508_s8 = sshll.u32 (%p206_p7), %s605_s19, 4  ;;  %s509_s8 = int_to_ptr.vmem [resolvable:$false] %s508_s8 }
  0x4a   : > { %p506_p10 = pnand (%p206_p7), %p505_p8, %p669_p9  ;;  %s510_s10 = scalar_lea.vmem (%p206_p7), %s509_s8, 256 }
  0x4b   : > { %p511_p12 = scmp.lt.s32.totalorder (%p206_p7), %s705_s23, %s509_s8  ;;  %p512_p0 = scmp.lt.s32.totalorder (%p206_p7), %s510_s10, %s504_s27 }
  0x4c   : > { %p507_p11 = pneg (%p206_p7), %p506_p10 }
  0x4d   : > { %p513_p1 = por %p512_p0, %p511_p12 }
  0x4f   : > { %p514_p2 = pnand %p513_p1, %p507_p11 }
  0x51   : > { %517 = shalt.err (!%p514_p2)
}
  0x52   : > { %s518_s30 = scalar_lea.hbm %s701_s22, 128  ;;  %s522_s11 = scalar_lea.hbm %s757_s3, 256 }
  0x53   : > { %p519_p3 = scmp.ne.s32.totalorder %s701_s22, %s518_s30  ;;  %p523_p6 = scmp.lt.u32.totalorder %s701_s22, %s757_s3 }
  0x54   : > { %p524_p7 = scmp.lt.u32.totalorder %s522_s11, %s518_s30  ;;  %p526_p10 = scmp.lt.u32.totalorder %s518_s30, %s701_s22 }
  0x55   : > { %p520_p4 = pnand %p519_p3, %p669_p9 }
  0x56   : > { %p525_p8 = por %p524_p7, %p523_p6 }
  0x57   : > { %p521_p5 = pneg %p520_p4 }
  0x58   : > { %p527_p11 = por %p526_p10, %p525_p8 }
  0x5a   : > { %p528_p12 = pnand %p527_p11, %p521_p5 }
  0x5c   : > { %531 = shalt.err (!%p528_p12)
}
  0x5d   : > { %420 = dma.vmem_to_hbm [thread:$0]  (%p669_p9), %s705_s23, 128, %s701_s22, %s231_s25  }
  0x5e PF: > { %p426_p0 = scmp.ge.s32.totalorder %s594_s21, 2  ;;  %s257_s13 = sand.u32 1, %s574_s17  }
  0x5f   : > { %s258_s4 = scalar_lea.sflag [#allocation7], %s257_s13 }
  0x60   : > { %p423_p1 = pnand %p426_p0, %p676_p13 }
  0x62   : > { %569 = dma.done.wait (!%p423_p1), %s258_s4, 128  }
  0x63   : > { %571 = vsyncadd (!%p423_p1), %s258_s4, 4294967168  ;;  %s22_s21 = sadd.s32 1, %s594_s21   ;;  %s760_s17 = smov %s578_s18 }
  0x64   : > { %p19_p2 = scmp.ge.s32.totalorder %s22_s21, 4   ;;  %s761_s18 = smov %s582_s0 }
  0x65   : > { %s762_s0 = smov %s682_s29  ;;  %s763_s19 = smov %s590_s20 }
  0x66   : > { %s764_s20 = smov %s766_s24  ;;  %21 = sbr.rel (!%p19_p2) target bundleno = 19 (0x13), region = 146 }
  0x6d   :  { %263 = vsyncpa [#allocation7], 1 }
  0x6e   :  { %265 = vsyncpa [#allocation7 + $0x1], 1 }
  0x6f   :  { %266 = vsyncmov [#allocation3] }
  0x72   :  { %s267_s26 = vpop.sfrf %266 }
  0x73   :  { %p412_p9 = scmp.ne.s32.totalorder %s267_s26, 0 }
  0x75   :  { %271 = shalt.err (%p412_p9)  }
  0x76   :  { %273 = vsyncmov [#allocation3 + $0x1] }
  0x79   :  { %s274_s28 = vpop.sfrf %273 }
  0x7a   :  { %p413_p13 = scmp.ne.s32.totalorder %s274_s28, 0 }
  0x7c   :  { %278 = shalt.err (%p413_p13)  }
  0x7d   :  { %280 = vsyncmov [#allocation3 + $0x2] }
  0x80   :  { %s281_s7 = vpop.sfrf %280 }
  0x81   :  { %p414_p3 = scmp.ne.s32.totalorder %s281_s7, 0 }
  0x83   :  { %285 = shalt.err (%p414_p3)  }
  0x84   :  { %287 = vsyncmov [#allocation3 + $0x3] }
  0x87   :  { %s288_s29 = vpop.sfrf %287 }
  0x88   :  { %p415_p4 = scmp.ne.s32.totalorder %s288_s29, 0 }
  0x8a   :  { %292 = shalt.err (%p415_p4)  }
  0x8b   :  { %294 = vsyncmov [#allocation3 + $0x4] }
  0x8e   :  { %s295_s21 = vpop.sfrf %294 }
  0x8f   :  { %p416_p5 = scmp.ne.s32.totalorder %s295_s21, 0 }
  0x91   :  { %299 = shalt.err (%p416_p5)  }
  0x92   :  { %301 = vsyncmov [#allocation3 + $0x5] }
  0x95   :  { %s302_s1 = vpop.sfrf %301 }
  0x96   :  { %p417_p6 = scmp.ne.s32.totalorder %s302_s1, 0 }
  0x98   :  { %306 = shalt.err (%p417_p6)  }
  0x99   :  { %308 = vsyncmov [#allocation3 + $0x6] }
  0x9c   :  { %s309_s2 = vpop.sfrf %308 }
  0x9d   :  { %p418_p7 = scmp.ne.s32.totalorder %s309_s2, 0 }
  0x9f   :  { %313 = shalt.err (%p418_p7)  }
  0xa0   :  { %315 = vsyncmov [#allocation3 + $0x7] }
  0xa3   :  { %s316_s3 = vpop.sfrf %315 }
  0xa4   :  { %p419_p8 = scmp.ne.s32.totalorder %s316_s3, 0 }
  0xa6   :  { %320 = shalt.err (%p419_p8)  }

</bundles_post_ra>
